<compile_context>
chip_gen: v5e
topology: v5e:2x2
jax: 0.10.0
libtpu: 0.0.40
codegen_flags: <defaults>
</compile_context>

<pallas_src>
import jax
import jax.numpy as jnp
from jax.experimental import pallas as pl
from jax.experimental.pallas import tpu as pltpu


def _round_up(n, m):
    return ((n + m - 1) // m) * m


def _pick_time_chunk(T, Bb, Hp, budget_bytes):
    """Largest time-chunk Tc (divisor of T, <=128) whose double-buffered blocks fit."""
    fixed = (2 * Hp * Hp + 4 * Bb * Hp) * 4          # whh (x2) + h0/hn (x2 each)
    per_t = 4 * Bb * Hp * 4                          # 2x xproj block + 2x hid block
    avail = max(budget_bytes - fixed, per_t)
    tc_cap = max(1, min(int(avail // per_t), 128, T))
    for tc in range(tc_cap, 0, -1):
        if T % tc == 0:
            return tc
    return 1


def _largest_aligned_divisor(n, cap, align=8):
    d = min(cap, n)
    d -= d % align
    while d >= align:
        if n % d == 0:
            return d
        d -= align
    return n


def _rnn_recurrence_kernel(xproj_ref, h0_ref, whh_ref, hid_ref, hn_ref):
    """One grid step = Tc timesteps of the recurrence for one batch block.

    xproj_ref : (Tc, Bb, Hp)  precomputed x_t @ W_ih^T + (b_ih + b_hh), zero-padded
    h0_ref    : (Bb, Hp)      initial hidden state (zero-padded)
    whh_ref   : (Hp, Hp)      W_hh^T (zero-padded)
    hid_ref   : (Tc, Bb, Hp)  per-chunk hidden states (full-tile stores)
    hn_ref    : (Bb, Hp)      resident output block = loop-carried hidden state
    """
    c = pl.program_id(1)  # time-chunk index (grid axis 1, "arbitrary")

    @pl.when(c == 0)
    def _():
        hn_ref[...] = h0_ref[...]

    tc = xproj_ref.shape[0]

    def step(s, h):
        # Only the true sequential minimum lives here: (Bb,Hp)x(Hp,Hp) matmul + tanh.
        h_new = jnp.tanh(
            xproj_ref[s]
            + jnp.dot(h, whh_ref[...], preferred_element_type=jnp.float32)
        )
        hid_ref[s] = h_new            # (Bb, Hp): full (8,128) tiles, unmasked stores
        return h_new

    # Carried h is (Bb, Hp) f32 -> keep Bb*Hp*4 well under the vreg file (~128 KiB).
    h_final = jax.lax.fori_loop(0, tc, step, hn_ref[...], unroll=min(8, tc))
    hn_ref[...] = h_final


def _head_kernel(hid_ref, wout_ref, bout_ref, y_ref):
    """Batched output head: one MXU matmul per row block, lane-dense store."""
    y_ref[...] = (
        jnp.dot(hid_ref[...], wout_ref[...], preferred_element_type=jnp.float32)
        + bout_ref[...]
    )


def rnn_forward(x, state, params, class_num, num_hiddens, num_outputs):
    """x: (batch, seq) int indices; state: (1, batch, hidden) or None."""
    del class_num  # vocab size is implied by W_ih's shape; one-hot is never materialized
    B, T = x.shape
    H, O = num_hiddens, num_outputs
    f32 = jnp.float32

    # (8,128)-aligned padded sizes.
    Bp = _round_up(B, 8)
    Hp = _round_up(H, 128)
    Op = _round_up(O, 128)

    wih_t = params["w_ih"].T.astype(f32)                       # (C, H)
    whh_t = params["w_hh"].T.astype(f32)                       # (H, H)
    wout_t = params["w_out"].T.astype(f32)                     # (H, O)
    b_comb = (params["b_ih"] + params["b_hh"]).astype(f32)     # (H,)
    bout = params["b_out"].astype(f32)                         # (O,)

    # Zero-pad weights/biases: zeros keep padded hidden lanes inert (tanh(0) = 0) and
    # padded output lanes are sliced off after the head.
    wih_tp = jnp.zeros((wih_t.shape[0], Hp), f32).at[:, :H].set(wih_t)
    whh_tp = jnp.zeros((Hp, Hp), f32).at[:H, :H].set(whh_t)
    wout_tp = jnp.zeros((Hp, Op), f32).at[:H, :O].set(wout_t)
    b_p = jnp.zeros((Hp,), f32).at[:H].set(b_comb)
    bout_p = jnp.zeros((1, Op), f32).at[0, :O].set(bout)

    # Embedding gather replaces one_hot + matmul: one_hot(x_t) @ W_ih^T == W_ih^T[x_t].
    # Time-major (T, B, Hp), combined bias folded in once; then batch zero-padded.
    xproj = jnp.take(wih_tp, x.T, axis=0) + b_p                # (T, B, Hp)
    xproj = jnp.zeros((T, Bp, Hp), f32).at[:, :B, :].set(xproj)

    if state is None:
        h0 = jnp.zeros((Bp, Hp), f32)
    else:
        h0 = jnp.zeros((Bp, Hp), f32).at[:B, :H].set(state.reshape(B, H).astype(f32))

    # Batch blocks: independent across batch -> "parallel" grid axis (sharded across
    # v7x's 2 TensorCores when Bp is large enough; neutral on 1-TC v5e/v6e).
    nb = 2 if (Bp >= 16 and Bp % 16 == 0) else 1
    Bb = Bp // nb

    # VMEM sizing: explicit budget + limit keeps the biggest chunk that actually fits
    # on all of v5e (16 MiB scoped default), v6e (32 MiB), v7x (64 MiB physical).
    VMEM_BUDGET = 24 * 1024 * 1024
    VMEM_LIMIT = 32 * 1024 * 1024
    Tc = _pick_time_chunk(T, Bb, Hp, VMEM_BUDGET)
    num_chunks = T // Tc

    # ---- Kernel 1: the serial recurrence (emits all hidden states + final state). ----
    hid, hn = pl.pallas_call(
        _rnn_recurrence_kernel,
        out_shape=(
            jax.ShapeDtypeStruct((T, Bp, Hp), f32),   # all hidden states
            jax.ShapeDtypeStruct((Bp, Hp), f32),      # final hidden state
        ),
        grid_spec=pltpu.PrefetchScalarGridSpec(
            num_scalar_prefetch=0,
            grid=(nb, num_chunks),
            in_specs=[
                pl.BlockSpec((Tc, Bb, Hp), lambda bi, c: (c, bi, 0)),   # xproj chunk
                pl.BlockSpec((Bb, Hp), lambda bi, c: (bi, 0)),          # h0
                pl.BlockSpec((Hp, Hp), lambda bi, c: (0, 0)),           # W_hh^T
            ],
            out_specs=[
                pl.BlockSpec((Tc, Bb, Hp), lambda bi, c: (c, bi, 0)),   # hidden states
                pl.BlockSpec((Bb, Hp), lambda bi, c: (bi, 0)),          # final state (resident)
            ],
        ),
        compiler_params=pltpu.CompilerParams(
            dimension_semantics=("parallel", "arbitrary"),  # batch parallel, time serial
            vmem_limit_bytes=VMEM_LIMIT,
        ),
    )(xproj, h0, whh_tp)

    # ---- Kernel 2: output head, fully parallel, off the serial critical path. ----
    rows = T * Bp
    Rm = _largest_aligned_divisor(rows, cap=512, align=8)
    hid2d = hid.reshape(rows, Hp)   # contiguous; rows ordered (t, b) like view(-1, H)

    y_pad = pl.pallas_call(
        _head_kernel,
        out_shape=jax.ShapeDtypeStruct((rows, Op), f32),
        grid_spec=pltpu.PrefetchScalarGridSpec(
            num_scalar_prefetch=0,
            grid=(rows // Rm,),
            in_specs=[
                pl.BlockSpec((Rm, Hp), lambda i: (i, 0)),   # hidden-state rows
                pl.BlockSpec((Hp, Op), lambda i: (0, 0)),   # W_out^T
                pl.BlockSpec((1, Op), lambda i: (0, 0)),    # b_out
            ],
            out_specs=pl.BlockSpec((Rm, Op), lambda i: (i, 0)),  # lane-dense logits
        ),
        compiler_params=pltpu.CompilerParams(
            dimension_semantics=("parallel",),
            vmem_limit_bytes=VMEM_LIMIT,
        ),
    )(hid2d, wout_tp, bout_p)

    # Strip padding: (T*Bp, Op) -> (T, B, O) -> (T*B, O); hn -> (1, B, H).
    result = y_pad.reshape(T, Bp, Op)[:, :B, :O].reshape(T * B, O)
    new_state = hn[:B, :H].reshape(1, B, H)
    return result, new_state


def _reference_forward(x, state, params, class_num, num_hiddens, num_outputs):
    B, T = x.shape
    x_feat = jax.nn.one_hot(x.T, class_num, dtype=jnp.float32)
    h = (jnp.zeros((B, num_hiddens), jnp.float32) if state is None
         else state.reshape(B, num_hiddens))
    b = params["b_ih"] + params["b_hh"]
    ys = []
    for t in range(T):
        h = jnp.tanh(x_feat[t] @ params["w_ih"].T + h @ params["w_hh"].T + b)
        ys.append(h)
    rnn_y = jnp.stack(ys)
    result = rnn_y.reshape(-1, num_hiddens) @ params["w_out"].T + params["b_out"]
    return result, h[None]


if __name__ == "__main__":
    # Small, consistent shapes: vocab (class_num) = 32, hidden = 32, outputs = 32, batch = 2, seq = 8.
    class_num = 32
    num_hiddens = 32
    num_outputs = 32
    batch, seq = 2, 8

    key = jax.random.PRNGKey(0)
    k = jax.random.split(key, 7)

    params = {
        "w_ih": 0.1 * jax.random.normal(k[0], (num_hiddens, class_num), jnp.float32),
        "w_hh": 0.1 * jax.random.normal(k[1], (num_hiddens, num_hiddens), jnp.float32),
        "b_ih": 0.1 * jax.random.normal(k[2], (num_hiddens,), jnp.float32),
        "b_hh": 0.1 * jax.random.normal(k[3], (num_hiddens,), jnp.float32),
        "w_out": 0.1 * jax.random.normal(k[4], (num_outputs, num_hiddens), jnp.float32),
        "b_out": 0.1 * jax.random.normal(k[5], (num_outputs,), jnp.float32),
    }

    x = jax.random.randint(k[6], (batch, seq), 0, class_num, dtype=jnp.int32)
    state = None  # matches forward(x, state=None)

    result, new_state = rnn_forward(x, state, params, class_num, num_hiddens, num_outputs)
    result = jax.block_until_ready(result)
    new_state = jax.block_until_ready(new_state)

    # Sanity check against a pure-JAX reference of the PyTorch semantics.
    ref_result, ref_state = _reference_forward(x, state, params, class_num, num_hiddens, num_outputs)
    assert result.shape == (seq * batch, num_outputs)
    assert new_state.shape == (1, batch, num_hiddens)
    assert jnp.allclose(result, ref_result, atol=1e-5, rtol=1e-5)
    assert jnp.allclose(new_state, ref_state, atol=1e-5, rtol=1e-5)

    print("KERNEL_OK")
</pallas_src>

<mosaic_0001>
module attributes {stable_mosaic.version = 11 : i64} {
  func.func @_rnn_recurrence_kernel(%arg0: i32, %arg1: i32, %arg2: memref<8x8x128xf32, #tpu.memory_space<vmem>>, %arg3: memref<8x128xf32, #tpu.memory_space<vmem>>, %arg4: memref<128x128xf32, #tpu.memory_space<vmem>>, %arg5: memref<8x8x128xf32, #tpu.memory_space<vmem>>, %arg6: memref<8x128xf32, #tpu.memory_space<vmem>>) attributes {dimension_semantics = [#tpu.dimension_semantics<parallel>, #tpu.dimension_semantics<arbitrary>], iteration_bounds = array<i64: 1, 1>, scalar_prefetch = 0 : i64, scratch_operands = 0 : i64, tpu.core_type = #tpu.core_type<tc>, window_params = [{transform_indices = @transform_0, window_bounds = array<i64: 8, 8, 128>}, {transform_indices = @transform_1, window_bounds = array<i64: 8, 128>}, {pipeline_mode = #tpu.pipeline_mode<synchronous>, transform_indices = @transform_2, window_bounds = array<i64: 128, 128>}, {transform_indices = @transform_3, window_bounds = array<i64: 8, 8, 128>}, {transform_indices = @transform_4, window_bounds = array<i64: 8, 128>}]} {
    %c0_i32 = arith.constant 0 : i32
    %0 = arith.cmpi eq, %arg1, %c0_i32 : i32
    %1 = arith.extui %0 : i1 to i32
    %c0_i32_0 = arith.constant 0 : i32
    %2 = arith.cmpi ne, %1, %c0_i32_0 : i32
    scf.if %2 {
      %c0_60 = arith.constant 0 : index
      %c0_61 = arith.constant 0 : index
      %93 = vector.load %arg3[%c0_60, %c0_61] : memref<8x128xf32, #tpu.memory_space<vmem>>, vector<8x128xf32>
      %c0_62 = arith.constant 0 : index
      %c0_63 = arith.constant 0 : index
      %94 = vector.load %arg6[%c0_62, %c0_63] : memref<8x128xf32, #tpu.memory_space<vmem>>, vector<8x128xf32>
      tpu.vector_store %arg6[%c0_62, %c0_63], %93 {strides = array<i32>} : memref<8x128xf32, #tpu.memory_space<vmem>>, vector<8x128xf32>,
    } else {
    }
    %c0 = arith.constant 0 : index
    %c0_1 = arith.constant 0 : index
    %3 = vector.load %arg6[%c0, %c0_1] : memref<8x128xf32, #tpu.memory_space<vmem>>, vector<8x128xf32>
    %c0_i32_2 = arith.constant 0 : i32
    %4 = arith.index_cast %c0_i32_2 : i32 to index
    %c0_3 = arith.constant 0 : index
    %c0_4 = arith.constant 0 : index
    %5 = vector.load %arg2[%4, %c0_3, %c0_4] : memref<8x8x128xf32, #tpu.memory_space<vmem>>, vector<1x8x128xf32>
    %6 = vector.shape_cast %5 : vector<1x8x128xf32> to vector<8x128xf32>
    %c0_5 = arith.constant 0 : index
    %c0_6 = arith.constant 0 : index
    %7 = vector.load %arg4[%c0_5, %c0_6] : memref<128x128xf32, #tpu.memory_space<vmem>>, vector<128x128xf32>
    %cst = arith.constant dense<0.000000e+00> : vector<8x128xf32>
    %8 = tpu.matmul %3, %7, %cst {dimension_numbers = #tpu.dot_dimension_numbers<[1], [0], [0], [1], [0, 0, 1, 1], [], []>} : vector<8x128xf32>, vector<128x128xf32>, vector<8x128xf32> -> vector<8x128xf32>
    %9 = arith.addf %6, %8 : vector<8x128xf32>
    %10 = math.tanh %9 : vector<8x128xf32>
    %11 = arith.index_cast %c0_i32_2 : i32 to index
    %c0_7 = arith.constant 0 : index
    %c0_8 = arith.constant 0 : index
    %12 = vector.load %arg5[%11, %c0_7, %c0_8] : memref<8x8x128xf32, #tpu.memory_space<vmem>>, vector<1x8x128xf32>
    %13 = vector.shape_cast %12 : vector<1x8x128xf32> to vector<8x128xf32>
    %14 = vector.shape_cast %10 : vector<8x128xf32> to vector<1x8x128xf32>
    tpu.vector_store %arg5[%11, %c0_7, %c0_8], %14 {strides = array<i32>} : memref<8x8x128xf32, #tpu.memory_space<vmem>>, vector<1x8x128xf32>,
    %c1_i32 = arith.constant 1 : i32
    %15 = arith.index_cast %c1_i32 : i32 to index
    %c0_9 = arith.constant 0 : index
    %c0_10 = arith.constant 0 : index
    %16 = vector.load %arg2[%15, %c0_9, %c0_10] : memref<8x8x128xf32, #tpu.memory_space<vmem>>, vector<1x8x128xf32>
    %17 = vector.shape_cast %16 : vector<1x8x128xf32> to vector<8x128xf32>
    %c0_11 = arith.constant 0 : index
    %c0_12 = arith.constant 0 : index
    %18 = vector.load %arg4[%c0_11, %c0_12] : memref<128x128xf32, #tpu.memory_space<vmem>>, vector<128x128xf32>
    %cst_13 = arith.constant dense<0.000000e+00> : vector<8x128xf32>
    %19 = tpu.matmul %10, %18, %cst_13 {dimension_numbers = #tpu.dot_dimension_numbers<[1], [0], [0], [1], [0, 0, 1, 1], [], []>} : vector<8x128xf32>, vector<128x128xf32>, vector<8x128xf32> -> vector<8x128xf32>
    %20 = arith.addf %17, %19 : vector<8x128xf32>
    %21 = math.tanh %20 : vector<8x128xf32>
    %22 = arith.index_cast %c1_i32 : i32 to index
    %c0_14 = arith.constant 0 : index
    %c0_15 = arith.constant 0 : index
    %23 = vector.load %arg5[%22, %c0_14, %c0_15] : memref<8x8x128xf32, #tpu.memory_space<vmem>>, vector<1x8x128xf32>
    %24 = vector.shape_cast %23 : vector<1x8x128xf32> to vector<8x128xf32>
    %25 = vector.shape_cast %21 : vector<8x128xf32> to vector<1x8x128xf32>
    tpu.vector_store %arg5[%22, %c0_14, %c0_15], %25 {strides = array<i32>} : memref<8x8x128xf32, #tpu.memory_space<vmem>>, vector<1x8x128xf32>,
    %c2_i32 = arith.constant 2 : i32
    %26 = arith.index_cast %c2_i32 : i32 to index
    %c0_16 = arith.constant 0 : index
    %c0_17 = arith.constant 0 : index
    %27 = vector.load %arg2[%26, %c0_16, %c0_17] : memref<8x8x128xf32, #tpu.memory_space<vmem>>, vector<1x8x128xf32>
    %28 = vector.shape_cast %27 : vector<1x8x128xf32> to vector<8x128xf32>
    %c0_18 = arith.constant 0 : index
    %c0_19 = arith.constant 0 : index
    %29 = vector.load %arg4[%c0_18, %c0_19] : memref<128x128xf32, #tpu.memory_space<vmem>>, vector<128x128xf32>
    %cst_20 = arith.constant dense<0.000000e+00> : vector<8x128xf32>
    %30 = tpu.matmul %21, %29, %cst_20 {dimension_numbers = #tpu.dot_dimension_numbers<[1], [0], [0], [1], [0, 0, 1, 1], [], []>} : vector<8x128xf32>, vector<128x128xf32>, vector<8x128xf32> -> vector<8x128xf32>
    %31 = arith.addf %28, %30 : vector<8x128xf32>
    %32 = math.tanh %31 : vector<8x128xf32>
    %33 = arith.index_cast %c2_i32 : i32 to index
    %c0_21 = arith.constant 0 : index
    %c0_22 = arith.constant 0 : index
    %34 = vector.load %arg5[%33, %c0_21, %c0_22] : memref<8x8x128xf32, #tpu.memory_space<vmem>>, vector<1x8x128xf32>
    %35 = vector.shape_cast %34 : vector<1x8x128xf32> to vector<8x128xf32>
    %36 = vector.shape_cast %32 : vector<8x128xf32> to vector<1x8x128xf32>
    tpu.vector_store %arg5[%33, %c0_21, %c0_22], %36 {strides = array<i32>} : memref<8x8x128xf32, #tpu.memory_space<vmem>>, vector<1x8x128xf32>,
    %c3_i32 = arith.constant 3 : i32
    %37 = arith.index_cast %c3_i32 : i32 to index
    %c0_23 = arith.constant 0 : index
    %c0_24 = arith.constant 0 : index
    %38 = vector.load %arg2[%37, %c0_23, %c0_24] : memref<8x8x128xf32, #tpu.memory_space<vmem>>, vector<1x8x128xf32>
    %39 = vector.shape_cast %38 : vector<1x8x128xf32> to vector<8x128xf32>
    %c0_25 = arith.constant 0 : index
    %c0_26 = arith.constant 0 : index
    %40 = vector.load %arg4[%c0_25, %c0_26] : memref<128x128xf32, #tpu.memory_space<vmem>>, vector<128x128xf32>
    %cst_27 = arith.constant dense<0.000000e+00> : vector<8x128xf32>
    %41 = tpu.matmul %32, %40, %cst_27 {dimension_numbers = #tpu.dot_dimension_numbers<[1], [0], [0], [1], [0, 0, 1, 1], [], []>} : vector<8x128xf32>, vector<128x128xf32>, vector<8x128xf32> -> vector<8x128xf32>
    %42 = arith.addf %39, %41 : vector<8x128xf32>
    %43 = math.tanh %42 : vector<8x128xf32>
    %44 = arith.index_cast %c3_i32 : i32 to index
    %c0_28 = arith.constant 0 : index
    %c0_29 = arith.constant 0 : index
    %45 = vector.load %arg5[%44, %c0_28, %c0_29] : memref<8x8x128xf32, #tpu.memory_space<vmem>>, vector<1x8x128xf32>
    %46 = vector.shape_cast %45 : vector<1x8x128xf32> to vector<8x128xf32>
    %47 = vector.shape_cast %43 : vector<8x128xf32> to vector<1x8x128xf32>
    tpu.vector_store %arg5[%44, %c0_28, %c0_29], %47 {strides = array<i32>} : memref<8x8x128xf32, #tpu.memory_space<vmem>>, vector<1x8x128xf32>,
    %c4_i32 = arith.constant 4 : i32
    %48 = arith.index_cast %c4_i32 : i32 to index
    %c0_30 = arith.constant 0 : index
    %c0_31 = arith.constant 0 : index
    %49 = vector.load %arg2[%48, %c0_30, %c0_31] : memref<8x8x128xf32, #tpu.memory_space<vmem>>, vector<1x8x128xf32>
    %50 = vector.shape_cast %49 : vector<1x8x128xf32> to vector<8x128xf32>
    %c0_32 = arith.constant 0 : index
    %c0_33 = arith.constant 0 : index
    %51 = vector.load %arg4[%c0_32, %c0_33] : memref<128x128xf32, #tpu.memory_space<vmem>>, vector<128x128xf32>
    %cst_34 = arith.constant dense<0.000000e+00> : vector<8x128xf32>
    %52 = tpu.matmul %43, %51, %cst_34 {dimension_numbers = #tpu.dot_dimension_numbers<[1], [0], [0], [1], [0, 0, 1, 1], [], []>} : vector<8x128xf32>, vector<128x128xf32>, vector<8x128xf32> -> vector<8x128xf32>
    %53 = arith.addf %50, %52 : vector<8x128xf32>
    %54 = math.tanh %53 : vector<8x128xf32>
    %55 = arith.index_cast %c4_i32 : i32 to index
    %c0_35 = arith.constant 0 : index
    %c0_36 = arith.constant 0 : index
    %56 = vector.load %arg5[%55, %c0_35, %c0_36] : memref<8x8x128xf32, #tpu.memory_space<vmem>>, vector<1x8x128xf32>
    %57 = vector.shape_cast %56 : vector<1x8x128xf32> to vector<8x128xf32>
    %58 = vector.shape_cast %54 : vector<8x128xf32> to vector<1x8x128xf32>
    tpu.vector_store %arg5[%55, %c0_35, %c0_36], %58 {strides = array<i32>} : memref<8x8x128xf32, #tpu.memory_space<vmem>>, vector<1x8x128xf32>,
    %c5_i32 = arith.constant 5 : i32
    %59 = arith.index_cast %c5_i32 : i32 to index
    %c0_37 = arith.constant 0 : index
    %c0_38 = arith.constant 0 : index
    %60 = vector.load %arg2[%59, %c0_37, %c0_38] : memref<8x8x128xf32, #tpu.memory_space<vmem>>, vector<1x8x128xf32>
    %61 = vector.shape_cast %60 : vector<1x8x128xf32> to vector<8x128xf32>
    %c0_39 = arith.constant 0 : index
    %c0_40 = arith.constant 0 : index
    %62 = vector.load %arg4[%c0_39, %c0_40] : memref<128x128xf32, #tpu.memory_space<vmem>>, vector<128x128xf32>
    %cst_41 = arith.constant dense<0.000000e+00> : vector<8x128xf32>
    %63 = tpu.matmul %54, %62, %cst_41 {dimension_numbers = #tpu.dot_dimension_numbers<[1], [0], [0], [1], [0, 0, 1, 1], [], []>} : vector<8x128xf32>, vector<128x128xf32>, vector<8x128xf32> -> vector<8x128xf32>
    %64 = arith.addf %61, %63 : vector<8x128xf32>
    %65 = math.tanh %64 : vector<8x128xf32>
    %66 = arith.index_cast %c5_i32 : i32 to index
    %c0_42 = arith.constant 0 : index
    %c0_43 = arith.constant 0 : index
    %67 = vector.load %arg5[%66, %c0_42, %c0_43] : memref<8x8x128xf32, #tpu.memory_space<vmem>>, vector<1x8x128xf32>
    %68 = vector.shape_cast %67 : vector<1x8x128xf32> to vector<8x128xf32>
    %69 = vector.shape_cast %65 : vector<8x128xf32> to vector<1x8x128xf32>
    tpu.vector_store %arg5[%66, %c0_42, %c0_43], %69 {strides = array<i32>} : memref<8x8x128xf32, #tpu.memory_space<vmem>>, vector<1x8x128xf32>,
    %c6_i32 = arith.constant 6 : i32
    %70 = arith.index_cast %c6_i32 : i32 to index
    %c0_44 = arith.constant 0 : index
    %c0_45 = arith.constant 0 : index
    %71 = vector.load %arg2[%70, %c0_44, %c0_45] : memref<8x8x128xf32, #tpu.memory_space<vmem>>, vector<1x8x128xf32>
    %72 = vector.shape_cast %71 : vector<1x8x128xf32> to vector<8x128xf32>
    %c0_46 = arith.constant 0 : index
    %c0_47 = arith.constant 0 : index
    %73 = vector.load %arg4[%c0_46, %c0_47] : memref<128x128xf32, #tpu.memory_space<vmem>>, vector<128x128xf32>
    %cst_48 = arith.constant dense<0.000000e+00> : vector<8x128xf32>
    %74 = tpu.matmul %65, %73, %cst_48 {dimension_numbers = #tpu.dot_dimension_numbers<[1], [0], [0], [1], [0, 0, 1, 1], [], []>} : vector<8x128xf32>, vector<128x128xf32>, vector<8x128xf32> -> vector<8x128xf32>
    %75 = arith.addf %72, %74 : vector<8x128xf32>
    %76 = math.tanh %75 : vector<8x128xf32>
    %77 = arith.index_cast %c6_i32 : i32 to index
    %c0_49 = arith.constant 0 : index
    %c0_50 = arith.constant 0 : index
    %78 = vector.load %arg5[%77, %c0_49, %c0_50] : memref<8x8x128xf32, #tpu.memory_space<vmem>>, vector<1x8x128xf32>
    %79 = vector.shape_cast %78 : vector<1x8x128xf32> to vector<8x128xf32>
    %80 = vector.shape_cast %76 : vector<8x128xf32> to vector<1x8x128xf32>
    tpu.vector_store %arg5[%77, %c0_49, %c0_50], %80 {strides = array<i32>} : memref<8x8x128xf32, #tpu.memory_space<vmem>>, vector<1x8x128xf32>,
    %c7_i32 = arith.constant 7 : i32
    %81 = arith.index_cast %c7_i32 : i32 to index
    %c0_51 = arith.constant 0 : index
    %c0_52 = arith.constant 0 : index
    %82 = vector.load %arg2[%81, %c0_51, %c0_52] : memref<8x8x128xf32, #tpu.memory_space<vmem>>, vector<1x8x128xf32>
    %83 = vector.shape_cast %82 : vector<1x8x128xf32> to vector<8x128xf32>
    %c0_53 = arith.constant 0 : index
    %c0_54 = arith.constant 0 : index
    %84 = vector.load %arg4[%c0_53, %c0_54] : memref<128x128xf32, #tpu.memory_space<vmem>>, vector<128x128xf32>
    %cst_55 = arith.constant dense<0.000000e+00> : vector<8x128xf32>
    %85 = tpu.matmul %76, %84, %cst_55 {dimension_numbers = #tpu.dot_dimension_numbers<[1], [0], [0], [1], [0, 0, 1, 1], [], []>} : vector<8x128xf32>, vector<128x128xf32>, vector<8x128xf32> -> vector<8x128xf32>
    %86 = arith.addf %83, %85 : vector<8x128xf32>
    %87 = math.tanh %86 : vector<8x128xf32>
    %88 = arith.index_cast %c7_i32 : i32 to index
    %c0_56 = arith.constant 0 : index
    %c0_57 = arith.constant 0 : index
    %89 = vector.load %arg5[%88, %c0_56, %c0_57] : memref<8x8x128xf32, #tpu.memory_space<vmem>>, vector<1x8x128xf32>
    %90 = vector.shape_cast %89 : vector<1x8x128xf32> to vector<8x128xf32>
    %91 = vector.shape_cast %87 : vector<8x128xf32> to vector<1x8x128xf32>
    tpu.vector_store %arg5[%88, %c0_56, %c0_57], %91 {strides = array<i32>} : memref<8x8x128xf32, #tpu.memory_space<vmem>>, vector<1x8x128xf32>,
    %c8_i32 = arith.constant 8 : i32
    %c0_58 = arith.constant 0 : index
    %c0_59 = arith.constant 0 : index
    %92 = vector.load %arg6[%c0_58, %c0_59] : memref<8x128xf32, #tpu.memory_space<vmem>>, vector<8x128xf32>
    tpu.vector_store %arg6[%c0_58, %c0_59], %87 {strides = array<i32>} : memref<8x128xf32, #tpu.memory_space<vmem>>, vector<8x128xf32>,
    return
  }
  func.func @transform_0(%arg0: i32, %arg1: i32) -> (i32, i32, i32) {
    %c0_i32 = arith.constant 0 : i32
    %c0_i32_0 = arith.constant 0 : i32
    return %arg1, %arg0, %c0_i32 : i32, i32, i32
  }
  func.func @transform_1(%arg0: i32, %arg1: i32) -> (i32, i32) {
    %c0_i32 = arith.constant 0 : i32
    %c0_i32_0 = arith.constant 0 : i32
    return %arg0, %c0_i32 : i32, i32
  }
  func.func @transform_2(%arg0: i32, %arg1: i32) -> (i32, i32) {
    %c0_i32 = arith.constant 0 : i32
    %c0_i32_0 = arith.constant 0 : i32
    %c0_i32_1 = arith.constant 0 : i32
    return %c0_i32, %c0_i32_0 : i32, i32
  }
  func.func @transform_3(%arg0: i32, %arg1: i32) -> (i32, i32, i32) {
    %c0_i32 = arith.constant 0 : i32
    %c0_i32_0 = arith.constant 0 : i32
    return %arg1, %arg0, %c0_i32 : i32, i32, i32
  }
  func.func @transform_4(%arg0: i32, %arg1: i32) -> (i32, i32) {
    %c0_i32 = arith.constant 0 : i32
    %c0_i32_0 = arith.constant 0 : i32
    return %arg0, %c0_i32 : i32, i32
  }
}

</mosaic_0001>

<bundles_post_ra>
// kernel: tpu_custom_call.1
= control target key start
LH: loop header
LB: loop body
LE: loop exit
PB: predicated region body
PF: predicated region fallthrough
CT: control target
= control target key end

     0   :  { %10 = vsyncpa [#allocation3], 0  ;;  %s808_s0 = inlined_call_operand.hbm [shape: f32[8,8,128], index: 0, kind: input, shape index: {}]   ;;  %s809_s1 = inlined_call_operand.hbm [shape: f32[8,128], index: 1, kind: input, shape index: {}]   ;;  %s810_s2 = inlined_call_operand.hbm [shape: f32[128,128], index: 2, kind: input, shape index: {}]   ;;  %s811_s3 = inlined_call_operand.hbm [shape: f32[8,8,128], index: 3, kind: output, shape index: {0}]   ;;  %s812_s4 = inlined_call_operand.hbm [shape: f32[8,128], index: 4, kind: output, shape index: {1}]  }
   0x1   :  { %11 = vsyncpa [#allocation6], 0 }
   0x2   :  { %12 = vsyncpa [#allocation4], 0  ;;  %s32_s17 = sshll.u32 %s809_s1, 4  ;;  %s33_s17 = int_to_ptr.hbm [resolvable:$true] %s32_s17 }
   0x3   :  { %13 = vsyncpa [#allocation10], 0  ;;  %s592_s18 = smov [#allocation5]   ;;  %s18_s22 = sshll.u32 %s808_s0, 4  ;;  %s19_s22 = int_to_ptr.hbm [resolvable:$true] %s18_s22 }
   0x4   :  { %s34_s19 = sshll.u32 %s592_s18, 4  ;;  %s593_s23 = smov [#allocation2]   ;;  %s35_s19 = int_to_ptr.vmem [resolvable:$true] %s34_s19 }
   0x5   :  { %37 = dma.hbm_to_vmem [thread:$0]  %s33_s17, 128, %s35_s19, [#allocation6]  }
   0x6   :  { %s20_s24 = sshll.u32 %s593_s23, 4  ;;  %s594_s25 = smov 128   ;;  %s21_s24 = int_to_ptr.vmem [resolvable:$true] %s20_s24 }
   0x7   :  { %s595_s26 = smov 8   ;;  %s42_s28 = sshll.u32 %s810_s2, 4  ;;  %s43_s28 = int_to_ptr.hbm [resolvable:$true] %s42_s28 }
   0x8   :  { %26 = dma.hbm_to_vmem [thread:$0]  %s19_s22, 1024, %s21_s24, [#allocation3], %s594_s25, %s594_s25, %s595_s26  }
   0x9   :  { %s596_s29 = smov [#allocation7]  }
   0xa   :  { %s44_s30 = sshll.u32 %s596_s29, 4  ;;  %s45_s30 = int_to_ptr.vmem [resolvable:$true] %s44_s30 }
   0xb   :  { %50 = dma.hbm_to_vmem [thread:$0]  %s43_s28, 2048, %s45_s30, [#allocation6], %s594_s25, %s594_s25, %s595_s26  }
   0xc   :  { %584 = dma.done.wait [#allocation3], 1024  }
   0xd   :  { %585 = vsyncadd [#allocation3], 4294966272 }
   0xe   :  { %586 = dma.done.wait [#allocation6], 2176  }
   0xf   :  { %587 = vsyncadd [#allocation6], 4294965120  ;;  %v639_v0 = vld [vmem:[#allocation7 + $0x78] sm:$0xff]  ;;  %v641_v1 = vld [vmem:[#allocation7 + $0x70] sm:$0xff]  ;;  %s597_s0 = smov [#allocation8]   ;;  %s411_s7 = sshll.u32 %s811_s3, 4  ;;  %s412_s7 = int_to_ptr.hbm [resolvable:$true] %s411_s7 }
  0x10   :  { %87 = vmatpush.msra.mxu0 %v639_v0  ;;  %128 = vmatpush.msra.mxu1 %v639_v0  ;;  %v645_v2 = vld [vmem:[#allocation7 + $0x68] sm:$0xff]  ;;  %v651_v3 = vld [vmem:[#allocation7 + $0x60] sm:$0xff]  ;;  %v657_v4 = vld [vmem:[#allocation7 + $0x58] sm:$0xff]  ;;  %s409_s2 = sshll.u32 %s597_s0, 4  ;;  %s598_s8 = smov [#allocation9]   ;;  %s410_s2 = int_to_ptr.vmem [resolvable:$true] %s409_s2 }
  0x11   :  { %170 = vmatpush.msra.mxu2 %v639_v0  ;;  %212 = vmatpush.msra.mxu3 %v639_v0  ;;  %v663_v5 = vld [vmem:[#allocation7 + $0x50] sm:$0xff]  ;;  %v669_v6 = vld [vmem:[#allocation7 + $0x48] sm:$0xff]  ;;  %v675_v7 = vld [vmem:[#allocation7 + $0x40] sm:$0xff]  ;;  %s423_s9 = sshll.u32 %s598_s8, 4  ;;  %s425_s12 = sshll.u32 %s812_s4, 4  ;;  %s424_s9 = int_to_ptr.vmem [resolvable:$true] %s423_s9  ;;  %s426_s12 = int_to_ptr.hbm [resolvable:$true] %s425_s12 }
  0x12   :  { %88 = vmatpush.msra.mxu0 %v641_v1  ;;  %129 = vmatpush.msra.mxu1 %v641_v1  ;;  %v681_v8 = vld [vmem:[#allocation7 + $0x38] sm:$0xff]  ;;  %v687_v9 = vld [vmem:[#allocation7 + $0x30] sm:$0xff]  ;;  %v693_v10 = vld [vmem:[#allocation7 + $0x28] sm:$0xff] }
  0x13   :  { %171 = vmatpush.msra.mxu2 %v641_v1  ;;  %213 = vmatpush.msra.mxu3 %v641_v1  ;;  %v699_v11 = vld [vmem:[#allocation7 + $0x20] sm:$0xff]  ;;  %v705_v12 = vld [vmem:[#allocation7 + $0x18] sm:$0xff]  ;;  %v711_v13 = vld [vmem:[#allocation7 + $0x10] sm:$0xff] }
  0x14   :  { %89 = vmatpush.msra.mxu0 %v645_v2  ;;  %130 = vmatpush.msra.mxu1 %v645_v2  ;;  %v717_v14 = vld [vmem:[#allocation7 + $0x8] sm:$0xff]  ;;  %v723_v15 = vld [vmem:[#allocation7] sm:$0xff]  ;;  %v67_v16 = vld [vmem:[#allocation5] sm:$0xff] }
  0x15   :  { %172 = vmatpush.msra.mxu2 %v645_v2  ;;  %214 = vmatpush.msra.mxu3 %v645_v2  ;;  %v70_v17 = vld [vmem:[#allocation2] sm:$0xff]  ;;  %v111_v21 = vld [vmem:[#allocation2 + $0x8] sm:$0xff]  ;;  %v153_v25 = vld [vmem:[#allocation2 + $0x10] sm:$0xff] }
  0x16   :  { %90 = vmatpush.msra.mxu0 %v651_v3  ;;  %131 = vmatpush.msra.mxu1 %v651_v3  ;;  %v195_v29 = vld [vmem:[#allocation2 + $0x18] sm:$0xff]  ;;  %v237_v33 = vld [vmem:[#allocation2 + $0x20] sm:$0xff]  ;;  %v279_v37 = vld [vmem:[#allocation2 + $0x28] sm:$0xff] }
  0x17   :  { %173 = vmatpush.msra.mxu2 %v651_v3  ;;  %215 = vmatpush.msra.mxu3 %v651_v3  ;;  %v321_v41 = vld [vmem:[#allocation2 + $0x30] sm:$0xff]  ;;  %v363_v45 = vld [vmem:[#allocation2 + $0x38] sm:$0xff] }
  0x18   :  { %91 = vmatpush.msra.mxu0 %v657_v4  ;;  %132 = vmatpush.msra.mxu1 %v657_v4 }
  0x19   :  { %174 = vmatpush.msra.mxu2 %v657_v4  ;;  %216 = vmatpush.msra.mxu3 %v657_v4 }
  0x1a   :  { %92 = vmatpush.msra.mxu0 %v663_v5  ;;  %133 = vmatpush.msra.mxu1 %v663_v5 }
  0x1b   :  { %175 = vmatpush.msra.mxu2 %v663_v5  ;;  %217 = vmatpush.msra.mxu3 %v663_v5 }
  0x1c   :  { %93 = vmatpush.msra.mxu0 %v669_v6  ;;  %134 = vmatpush.msra.mxu1 %v669_v6 }
  0x1d   :  { %176 = vmatpush.msra.mxu2 %v669_v6  ;;  %218 = vmatpush.msra.mxu3 %v669_v6 }
  0x1e   :  { %94 = vmatpush.msra.mxu0 %v675_v7  ;;  %135 = vmatpush.msra.mxu1 %v675_v7 }
  0x1f   :  { %177 = vmatpush.msra.mxu2 %v675_v7  ;;  %219 = vmatpush.msra.mxu3 %v675_v7 }
  0x20   :  { %95 = vmatpush.msra.mxu0 %v681_v8  ;;  %136 = vmatpush.msra.mxu1 %v681_v8 }
  0x21   :  { %178 = vmatpush.msra.mxu2 %v681_v8  ;;  %220 = vmatpush.msra.mxu3 %v681_v8 }
  0x22   :  { %96 = vmatpush.msra.mxu0 %v687_v9  ;;  %137 = vmatpush.msra.mxu1 %v687_v9 }
  0x23   :  { %179 = vmatpush.msra.mxu2 %v687_v9  ;;  %221 = vmatpush.msra.mxu3 %v687_v9 }
  0x24   :  { %97 = vmatpush.msra.mxu0 %v693_v10  ;;  %138 = vmatpush.msra.mxu1 %v693_v10 }
  0x25   :  { %180 = vmatpush.msra.mxu2 %v693_v10  ;;  %222 = vmatpush.msra.mxu3 %v693_v10 }
  0x26   :  { %98 = vmatpush.msra.mxu0 %v699_v11  ;;  %139 = vmatpush.msra.mxu1 %v699_v11 }
  0x27   :  { %181 = vmatpush.msra.mxu2 %v699_v11  ;;  %223 = vmatpush.msra.mxu3 %v699_v11 }
  0x28   :  { %99 = vmatpush.msra.mxu0 %v705_v12  ;;  %140 = vmatpush.msra.mxu1 %v705_v12 }
  0x29   :  { %182 = vmatpush.msra.mxu2 %v705_v12  ;;  %224 = vmatpush.msra.mxu3 %v705_v12 }
  0x2a   :  { %100 = vmatpush.msra.mxu0 %v711_v13  ;;  %141 = vmatpush.msra.mxu1 %v711_v13 }
  0x2b   :  { %183 = vmatpush.msra.mxu2 %v711_v13  ;;  %225 = vmatpush.msra.mxu3 %v711_v13 }
  0x2c   :  { %101 = vmatpush.msra.mxu0 %v717_v14  ;;  %142 = vmatpush.msra.mxu1 %v717_v14 }
  0x2d   :  { %184 = vmatpush.msra.mxu2 %v717_v14  ;;  %226 = vmatpush.msra.mxu3 %v717_v14 }
  0x2e   :  { %102 = vmatpush.msra.mxu0 %v723_v15  ;;  %143 = vmatpush.msra.mxu1 %v723_v15 }
  0x2f   :  { %103 = vmatmul.f32.vlgmr.msra.gmra.mxu0 %v67_v16  ;;  %185 = vmatpush.msra.mxu2 %v723_v15 }
  0x30   :  { %227 = vmatpush.msra.mxu3 %v723_v15  ;;  %254 = vmatpush.msrb.mxu0 %v639_v0 }
  0x31   :  { %296 = vmatpush.msrb.mxu1 %v639_v0  ;;  %338 = vmatpush.msrb.mxu2 %v639_v0 }
  0x32   :  { %255 = vmatpush.msrb.mxu0 %v641_v1  ;;  %380 = vmatpush.msrb.mxu3 %v639_v0 }
  0x33   :  { %297 = vmatpush.msrb.mxu1 %v641_v1  ;;  %339 = vmatpush.msrb.mxu2 %v641_v1 }
  0x34   :  { %256 = vmatpush.msrb.mxu0 %v645_v2  ;;  %381 = vmatpush.msrb.mxu3 %v641_v1 }
  0x35   :  { %298 = vmatpush.msrb.mxu1 %v645_v2  ;;  %340 = vmatpush.msrb.mxu2 %v645_v2 }
  0x36   :  { %257 = vmatpush.msrb.mxu0 %v651_v3  ;;  %382 = vmatpush.msrb.mxu3 %v645_v2 }
  0x37   :  { %299 = vmatpush.msrb.mxu1 %v651_v3  ;;  %341 = vmatpush.msrb.mxu2 %v651_v3 }
  0x38   :  { %258 = vmatpush.msrb.mxu0 %v657_v4  ;;  %383 = vmatpush.msrb.mxu3 %v651_v3 }
  0x39   :  { %300 = vmatpush.msrb.mxu1 %v657_v4  ;;  %342 = vmatpush.msrb.mxu2 %v657_v4 }
  0x3a   :  { %259 = vmatpush.msrb.mxu0 %v663_v5  ;;  %384 = vmatpush.msrb.mxu3 %v657_v4 }
  0x3b   :  { %301 = vmatpush.msrb.mxu1 %v663_v5  ;;  %343 = vmatpush.msrb.mxu2 %v663_v5 }
  0x3c   :  { %260 = vmatpush.msrb.mxu0 %v669_v6  ;;  %385 = vmatpush.msrb.mxu3 %v663_v5 }
  0x3d   :  { %302 = vmatpush.msrb.mxu1 %v669_v6  ;;  %344 = vmatpush.msrb.mxu2 %v669_v6 }
  0x3e   :  { %261 = vmatpush.msrb.mxu0 %v675_v7  ;;  %386 = vmatpush.msrb.mxu3 %v669_v6 }
  0x3f   :  { %303 = vmatpush.msrb.mxu1 %v675_v7  ;;  %345 = vmatpush.msrb.mxu2 %v675_v7 }
  0x40   :  { %262 = vmatpush.msrb.mxu0 %v681_v8  ;;  %387 = vmatpush.msrb.mxu3 %v675_v7 }
  0x41   :  { %304 = vmatpush.msrb.mxu1 %v681_v8  ;;  %346 = vmatpush.msrb.mxu2 %v681_v8 }
  0x42   :  { %263 = vmatpush.msrb.mxu0 %v687_v9  ;;  %388 = vmatpush.msrb.mxu3 %v681_v8 }
  0x43   :  { %305 = vmatpush.msrb.mxu1 %v687_v9  ;;  %347 = vmatpush.msrb.mxu2 %v687_v9 }
  0x44   :  { %264 = vmatpush.msrb.mxu0 %v693_v10  ;;  %389 = vmatpush.msrb.mxu3 %v687_v9 }
  0x45   :  { %306 = vmatpush.msrb.mxu1 %v693_v10  ;;  %348 = vmatpush.msrb.mxu2 %v693_v10 }
  0x46   :  { %265 = vmatpush.msrb.mxu0 %v699_v11  ;;  %390 = vmatpush.msrb.mxu3 %v693_v10 }
  0x47   :  { %307 = vmatpush.msrb.mxu1 %v699_v11  ;;  %349 = vmatpush.msrb.mxu2 %v699_v11 }
  0x48   :  { %266 = vmatpush.msrb.mxu0 %v705_v12  ;;  %391 = vmatpush.msrb.mxu3 %v699_v11 }
  0x49   :  { %308 = vmatpush.msrb.mxu1 %v705_v12  ;;  %350 = vmatpush.msrb.mxu2 %v705_v12 }
  0x4a   :  { %267 = vmatpush.msrb.mxu0 %v711_v13  ;;  %392 = vmatpush.msrb.mxu3 %v705_v12 }
  0x4b   :  { %309 = vmatpush.msrb.mxu1 %v711_v13  ;;  %351 = vmatpush.msrb.mxu2 %v711_v13 }
  0x4c   :  { %268 = vmatpush.msrb.mxu0 %v717_v14  ;;  %393 = vmatpush.msrb.mxu3 %v711_v13 }
  0x4d   :  { %310 = vmatpush.msrb.mxu1 %v717_v14  ;;  %352 = vmatpush.msrb.mxu2 %v717_v14 }
  0x4e   :  { %269 = vmatpush.msrb.mxu0 %v723_v15  ;;  %394 = vmatpush.msrb.mxu3 %v717_v14 }
  0x4f   :  { %311 = vmatpush.msrb.mxu1 %v723_v15  ;;  %353 = vmatpush.msrb.mxu2 %v723_v15 }
  0x50   :  { %395 = vmatpush.msrb.mxu3 %v723_v15 }
  0xac   :  { %v104_v18 = vpop.f32.mrf.mxu0 }
  0xad   :  { %v107_v19 = vadd.f32 %v104_v18, %v70_v17 }
  0xaf   :  { %448 = vtanh.f32 %v107_v19 }
  0xb5   :  { %v449_v20 = vpop.eup %448 }
  0xb6   :  { %109 = vst [vmem:[#allocation8] sm:$0xff] %v449_v20  ;;  %144 = vmatmul.f32.vlgmr.msra.gmra.mxu1 %v449_v20 }
 0x133   :  { %v145_v22 = vpop.f32.mrf.mxu1 }
 0x134   :  { %v148_v23 = vadd.f32 %v145_v22, %v111_v21 }
 0x136   :  { %450 = vtanh.f32 %v148_v23 }
 0x13c   :  { %v451_v24 = vpop.eup %450 }
 0x13d   :  { %151 = vst [vmem:[#allocation8 + $0x8] sm:$0xff] %v451_v24  ;;  %186 = vmatmul.f32.vlgmr.msra.gmra.mxu2 %v451_v24 }
 0x1c0   :  { %v187_v26 = vpop.f32.mrf.mxu2 }
 0x1c1   :  { %v190_v27 = vadd.f32 %v187_v26, %v153_v25 }
 0x1c3   :  { %452 = vtanh.f32 %v190_v27 }
 0x1c9   :  { %v453_v28 = vpop.eup %452 }
 0x1ca   :  { %193 = vst [vmem:[#allocation8 + $0x10] sm:$0xff] %v453_v28  ;;  %228 = vmatmul.f32.vlgmr.msra.gmra.mxu3 %v453_v28 }
 0x24d   :  { %v229_v30 = vpop.f32.mrf.mxu3 }
 0x24e   :  { %v232_v31 = vadd.f32 %v229_v30, %v195_v29 }
 0x250   :  { %454 = vtanh.f32 %v232_v31 }
 0x256   :  { %v455_v32 = vpop.eup %454 }
 0x257   :  { %235 = vst [vmem:[#allocation8 + $0x18] sm:$0xff] %v455_v32  ;;  %270 = vmatmul.f32.vlgmr.msrb.gmra.mxu0 %v455_v32 }
 0x2d4   :  { %v271_v34 = vpop.f32.mrf.mxu0 }
 0x2d5   :  { %v274_v35 = vadd.f32 %v271_v34, %v237_v33 }
 0x2d7   :  { %456 = vtanh.f32 %v274_v35 }
 0x2dd   :  { %v457_v36 = vpop.eup %456 }
 0x2de   :  { %277 = vst [vmem:[#allocation8 + $0x20] sm:$0xff] %v457_v36  ;;  %312 = vmatmul.f32.vlgmr.msrb.gmra.mxu1 %v457_v36 }
 0x35b   :  { %v313_v38 = vpop.f32.mrf.mxu1 }
 0x35c   :  { %v316_v39 = vadd.f32 %v313_v38, %v279_v37 }
 0x35e   :  { %458 = vtanh.f32 %v316_v39 }
 0x364   :  { %v459_v40 = vpop.eup %458 }
 0x365   :  { %319 = vst [vmem:[#allocation8 + $0x28] sm:$0xff] %v459_v40  ;;  %354 = vmatmul.f32.vlgmr.msrb.gmra.mxu2 %v459_v40 }
 0x3e8   :  { %v355_v42 = vpop.f32.mrf.mxu2 }
 0x3e9   :  { %v358_v43 = vadd.f32 %v355_v42, %v321_v41 }
 0x3eb   :  { %460 = vtanh.f32 %v358_v43 }
 0x3f1   :  { %v461_v44 = vpop.eup %460 }
 0x3f2   :  { %361 = vst [vmem:[#allocation8 + $0x30] sm:$0xff] %v461_v44  ;;  %396 = vmatmul.f32.vlgmr.msrb.gmra.mxu3 %v461_v44 }
 0x475   :  { %v397_v46 = vpop.f32.mrf.mxu3 }
 0x476   :  { %v400_v47 = vadd.f32 %v397_v46, %v363_v45 }
 0x478   :  { %462 = vtanh.f32 %v400_v47 }
 0x47e   :  { %v463_v48 = vpop.eup %462 }
 0x47f   :  { %403 = vst [vmem:[#allocation8 + $0x38] sm:$0xff] %v463_v48 }
 0x480   :  { %404 = vst [vmem:[#allocation9] sm:$0xff] %v463_v48  ;;  %417 = dma.vmem_to_hbm [thread:$0]  %s410_s2, 1024, %s412_s7, [#allocation4], %s594_s25, %s594_s25, %s595_s26  }
 0x481   :  { %428 = dma.vmem_to_hbm [thread:$0]  %s424_s9, 128, %s426_s12, [#allocation10]  }
 0x482   :  { %588 = dma.done.wait [#allocation4], 1024  }
 0x483   :  { %589 = vsyncadd [#allocation4], 4294966272 }
 0x484   :  { %590 = dma.done.wait [#allocation10], 128  }
 0x485   :  { %591 = vsyncadd [#allocation10], 4294967168 }
 0x486   :  { %437 = vsyncpa [#allocation3], 1 }
 0x487   :  { %438 = vsyncpa [#allocation6], 1 }
 0x488   :  { %439 = vsyncpa [#allocation4], 1 }
 0x489   :  { %440 = vsyncpa [#allocation10], 1 }

</bundles_post_ra>
